<compile_context>
chip_gen: v7x
topology: tpu7x:2x2x1
jax: 0.10.0
libtpu: 0.0.40
codegen_flags: <defaults>
</compile_context>

<pallas_src>
import functools

import jax
import jax.numpy as jnp
from jax import lax
from jax.experimental import pallas as pl
from jax.experimental.pallas import tpu as pltpu


def fused_conv_bn_relu_kernel(lhs_ref, rhs_ref, gamma_ref, beta_ref, fold_ref, bcast_ref,
                              o_ref, y_acc, sum_acc, sq_acc, *, TM, M_TOTAL, EPS):
    """Fused conv (block-diag packed matmul) + global BN stats + BN apply + ReLU.

    lhs_ref:   (TM, PACK*K)   bf16  packed im2col tile
    rhs_ref:   (PACK*K, 128)  bf16  block-diagonal tap matrix (PACK copies of (K, Cout))
    gamma_ref: (1, Cout) f32
    beta_ref:  (1, Cout) f32
    fold_ref:  (128, Cout) f32  packed-lane -> channel fold matrix
    bcast_ref: (Cout, 128) f32  channel -> packed-lane broadcast matrix
    o_ref:     (Mp, 128) f32    final packed output (written only at the last grid step)
    y_acc:     (Mp, 128) f32 VMEM scratch, resident packed conv output
    sum_acc/sq_acc: (1, 128) f32 VMEM scratch, lane-dense running BN sums
    """
    step = pl.program_id(0)

    @pl.when(step == 0)
    def _():
        sum_acc[...] = jnp.zeros_like(sum_acc)
        sq_acc[...] = jnp.zeros_like(sq_acc)

    # One lane-dense MXU matmul per step; result is already in the packed (TM, 128) layout.
    y = jnp.dot(lhs_ref[...], rhs_ref[...], preferred_element_type=jnp.float32)

    # Lane-dense packed running BN sums (per (pack-group, channel) lane).
    sum_acc[...] += jnp.sum(y, axis=0, keepdims=True)
    sq_acc[...] += jnp.sum(y * y, axis=0, keepdims=True)

    if TM % 8 == 0:
        row0 = pl.multiple_of(step * TM, 8)
    else:
        row0 = step * TM
    y_acc[pl.ds(row0, TM), :] = y

    @pl.when(step == pl.num_programs(0) - 1)
    def _():
        inv_m = 1.0 / M_TOTAL
        # Fold the PACK groups into per-channel sums (tiny one-time matmuls).
        sum_c = jnp.dot(sum_acc[...], fold_ref[...], preferred_element_type=jnp.float32)
        sq_c = jnp.dot(sq_acc[...], fold_ref[...], preferred_element_type=jnp.float32)
        mean = sum_c * inv_m                       # (1, Cout)
        var = sq_c * inv_m - mean * mean           # biased (training-mode) variance
        inv_std = lax.rsqrt(var + EPS)
        scale_c = gamma_ref[...] * inv_std
        bias_c = beta_ref[...] - mean * scale_c
        # Broadcast per-channel params back to the packed 128-lane layout.
        scale_p = jnp.dot(scale_c, bcast_ref[...], preferred_element_type=jnp.float32)
        bias_p = jnp.dot(bias_c, bcast_ref[...], preferred_element_type=jnp.float32)
        o_ref[...] = jnp.maximum(y_acc[...] * scale_p + bias_p, 0.0).astype(o_ref.dtype)


def basic_conv(x_nchw, weight, gamma, beta, *, stride=1, padding=1, eps=1e-5):
    """x_nchw: (N, Cin, H, W) f32; weight: (Cout, Cin, KH, KW) (PyTorch layout)."""
    N, Cin, H, W = x_nchw.shape
    Cout, Cin_w, KH, KW = weight.shape
    assert Cin_w == Cin
    assert stride == 1, "TODO(synk): general stride"
    assert Cout <= 128 and 128 % Cout == 0, "TODO(synk): generic Cout lane packing"

    Hp, Wp = H + 2 * padding, W + 2 * padding
    Ho, Wo = Hp - KH + 1, Wp - KW + 1
    M = N * Ho * Wo                       # output pixels == BN sample count per channel
    K = KH * KW * Cin                     # im2col reduction length
    PACK = 128 // Cout                    # output pixels packed per 128-lane row
    LANES = PACK * Cout                   # == 128
    assert M % PACK == 0, "TODO(synk): ragged M (pad the last packed row)"
    Mp = M // PACK

    # Resident packed conv output must fit VMEM next to the double-buffered lhs tiles.
    assert Mp * LANES * 4 <= 16 * 1024 * 1024, "TODO(synk): two-pass fallback for large shapes"

    # ---- layout glue (wrapper side, pure plumbing; KB-scale for small Cin) ----
    xp = jnp.transpose(x_nchw, (0, 2, 3, 1))                       # NCHW -> NHWC
    xp = jnp.pad(xp, ((0, 0), (padding, padding), (padding, padding), (0, 0)))
    # im2col: K ordered as (kh, kw, cin), matching the tap-matrix ordering below.
    patches = jnp.stack(
        [xp[:, kh:kh + Ho, kw:kw + Wo, :] for kh in range(KH) for kw in range(KW)],
        axis=3)                                                    # (N, Ho, Wo, KH*KW, Cin)
    lhs = patches.reshape(M, K).reshape(Mp, PACK * K).astype(jnp.bfloat16)

    # tap matrix (K, Cout), then PACK-way block-diagonal RHS -> (PACK*K, 128)
    w_tap = jnp.transpose(weight, (2, 3, 1, 0)).reshape(K, Cout).astype(jnp.float32)
    rhs = jnp.kron(jnp.eye(PACK, dtype=jnp.float32), w_tap).astype(jnp.bfloat16)

    gamma2 = gamma.reshape(1, Cout).astype(jnp.float32)
    beta2 = beta.reshape(1, Cout).astype(jnp.float32)

    lane_ch = jnp.arange(LANES) % Cout
    fold = (lane_ch[:, None] == jnp.arange(Cout)[None, :]).astype(jnp.float32)   # (128, Cout)
    bcast = (jnp.arange(Cout)[:, None] == lane_ch[None, :]).astype(jnp.float32)  # (Cout, 128)

    # ---- tile selection over packed rows (big tiles to amortize per-step overhead) ----
    if Mp % 8 == 0:
        TM = 8
        for d in range(8, min(Mp, 2048) + 1, 8):
            if Mp % d == 0:
                TM = d
    else:
        TM = Mp                      # single full-extent block (allowed: equals array dim)
    grid = (Mp // TM,)

    kernel = functools.partial(fused_conv_bn_relu_kernel,
                               TM=TM, M_TOTAL=float(M), EPS=float(eps))

    cost = pl.CostEstimate(
        flops=2 * Mp * (PACK * K) * LANES + 6 * Mp * LANES,
        transcendentals=Cout,
        bytes_accessed=int(lhs.size * 2 + rhs.size * 2 + Mp * LANES * 4
                           + (gamma2.size + beta2.size + fold.size + bcast.size) * 4))

    out_packed = pl.pallas_call(
        kernel,
        out_shape=jax.ShapeDtypeStruct((Mp, LANES), jnp.float32),
        grid_spec=pltpu.PrefetchScalarGridSpec(
            num_scalar_prefetch=0,
            grid=grid,
            in_specs=[
                pl.BlockSpec((TM, PACK * K), lambda i: (i, 0)),      # packed im2col tile
                pl.BlockSpec((PACK * K, LANES), lambda i: (0, 0)),   # block-diag taps (resident)
                pl.BlockSpec((1, Cout), lambda i: (0, 0)),           # gamma
                pl.BlockSpec((1, Cout), lambda i: (0, 0)),           # beta
                pl.BlockSpec((LANES, Cout), lambda i: (0, 0)),       # fold matrix
                pl.BlockSpec((Cout, LANES), lambda i: (0, 0)),       # broadcast matrix
            ],
            out_specs=pl.BlockSpec((Mp, LANES), lambda i: (0, 0)),   # resident; written at last step
            scratch_shapes=[pltpu.VMEM((Mp, LANES), jnp.float32),
                            pltpu.VMEM((1, LANES), jnp.float32),
                            pltpu.VMEM((1, LANES), jnp.float32)],
        ),
        compiler_params=pltpu.CompilerParams(
            # Global BN stats + resident output -> sequential grid.
            dimension_semantics=("arbitrary",),
            # Safe on v5e/v6e (128 MiB physical) and v7x (64 MiB physical).
            vmem_limit_bytes=32 * 1024 * 1024,
        ),
        cost_estimate=cost,
    )(lhs, rhs, gamma2, beta2, fold, bcast)

    # ---- layout glue: unpack lane-dense slab back to NCHW (module semantics) ----
    out = out_packed.reshape(N, Ho, Wo, Cout).transpose(0, 3, 1, 2)
    return out


def reference(x_nchw, weight, gamma, beta, *, stride=1, padding=1):
    """Pure-JAX f32 reference: conv + training-mode BN + ReLU."""
    y = jax.lax.conv_general_dilated(
        x_nchw, weight, window_strides=(stride, stride),
        padding=[(padding, padding), (padding, padding)],
        dimension_numbers=("NCHW", "OIHW", "NCHW"))
    mean = jnp.mean(y, axis=(0, 2, 3), keepdims=True)
    var = jnp.mean((y - mean) ** 2, axis=(0, 2, 3), keepdims=True)
    y = (y - mean) * jax.lax.rsqrt(var + 1e-5)
    y = y * gamma.reshape(1, -1, 1, 1) + beta.reshape(1, -1, 1, 1)
    return jnp.maximum(y, 0.0)


if __name__ == "__main__":
    # BasicConv(in_planes=4, out_planes=8, kernel_size=3, stride=1, padding=1, bias=False)
    N, Cin, H, W = 2, 4, 16, 16
    Cout, KH, KW = 8, 3, 3

    key = jax.random.PRNGKey(0)
    kx, kw = jax.random.split(key)
    x = jax.random.normal(kx, (N, Cin, H, W), dtype=jnp.float32)
    fan_in = Cin * KH * KW
    weight = jax.random.normal(kw, (Cout, Cin, KH, KW), dtype=jnp.float32) * (2.0 / fan_in) ** 0.5
    # BatchNorm2d default init: gamma = 1, beta = 0
    gamma = jnp.ones((Cout,), dtype=jnp.float32)
    beta = jnp.zeros((Cout,), dtype=jnp.float32)

    out = jax.block_until_ready(basic_conv(x, weight, gamma, beta, stride=1, padding=1))
    ref = jax.block_until_ready(reference(x, weight, gamma, beta, stride=1, padding=1))

    assert out.shape == (N, Cout, H, W), out.shape
    # bf16 MXU operands vs. f32 reference -> compare at bf16-level tolerance
    assert jnp.allclose(out, ref, atol=5e-2, rtol=5e-2), float(jnp.max(jnp.abs(out - ref)))

    print("KERNEL_OK")
</pallas_src>

<mosaic_0001>
module attributes {stable_mosaic.version = 11 : i64} {
  func.func @fused_conv_bn_relu_kernel(%arg0: i32, %arg1: memref<32x576xbf16, #tpu.memory_space<vmem>>, %arg2: memref<576x128xbf16, #tpu.memory_space<vmem>>, %arg3: memref<1x8xf32, #tpu.memory_space<vmem>>, %arg4: memref<1x8xf32, #tpu.memory_space<vmem>>, %arg5: memref<128x8xf32, #tpu.memory_space<vmem>>, %arg6: memref<8x128xf32, #tpu.memory_space<vmem>>, %arg7: memref<32x128xf32, #tpu.memory_space<vmem>>, %arg8: memref<32x128xf32, #tpu.memory_space<vmem>>, %arg9: memref<1x128xf32, #tpu.memory_space<vmem>>, %arg10: memref<1x128xf32, #tpu.memory_space<vmem>>) attributes {dimension_semantics = [#tpu.dimension_semantics<arbitrary>], iteration_bounds = array<i64: 1>, scalar_prefetch = 0 : i64, scratch_operands = 3 : i64, tpu.core_type = #tpu.core_type<tc>, window_params = [{transform_indices = @transform_0, window_bounds = array<i64: 32, 576>}, {pipeline_mode = #tpu.pipeline_mode<synchronous>, transform_indices = @transform_1, window_bounds = array<i64: 576, 128>}, {pipeline_mode = #tpu.pipeline_mode<synchronous>, transform_indices = @transform_2, window_bounds = array<i64: 1, 8>}, {pipeline_mode = #tpu.pipeline_mode<synchronous>, transform_indices = @transform_3, window_bounds = array<i64: 1, 8>}, {pipeline_mode = #tpu.pipeline_mode<synchronous>, transform_indices = @transform_4, window_bounds = array<i64: 128, 8>}, {pipeline_mode = #tpu.pipeline_mode<synchronous>, transform_indices = @transform_5, window_bounds = array<i64: 8, 128>}, {pipeline_mode = #tpu.pipeline_mode<synchronous>, transform_indices = @transform_6, window_bounds = array<i64: 32, 128>}]} {
    %c0_i32 = arith.constant 0 : i32
    %0 = arith.cmpi eq, %arg0, %c0_i32 : i32
    %1 = arith.extui %0 : i1 to i32
    %c0_i32_0 = arith.constant 0 : i32
    %2 = arith.cmpi ne, %1, %c0_i32_0 : i32
    scf.if %2 {
      %cst_17 = arith.constant 0.000000e+00 : f32
      %24 = vector.broadcast %cst_17 : f32 to vector<1x128xf32>
      %c0_18 = arith.constant 0 : index
      %c0_19 = arith.constant 0 : index
      %25 = vector.load %arg9[%c0_18, %c0_19] : memref<1x128xf32, #tpu.memory_space<vmem>>, vector<1x128xf32>
      tpu.vector_store %arg9[%c0_18, %c0_19], %24 {strides = array<i32>} : memref<1x128xf32, #tpu.memory_space<vmem>>, vector<1x128xf32>,
      %cst_20 = arith.constant 0.000000e+00 : f32
      %26 = vector.broadcast %cst_20 : f32 to vector<1x128xf32>
      %c0_21 = arith.constant 0 : index
      %c0_22 = arith.constant 0 : index
      %27 = vector.load %arg10[%c0_21, %c0_22] : memref<1x128xf32, #tpu.memory_space<vmem>>, vector<1x128xf32>
      tpu.vector_store %arg10[%c0_21, %c0_22], %26 {strides = array<i32>} : memref<1x128xf32, #tpu.memory_space<vmem>>, vector<1x128xf32>,
    } else {
    }
    %c0 = arith.constant 0 : index
    %c0_1 = arith.constant 0 : index
    %3 = vector.load %arg1[%c0, %c0_1] : memref<32x576xbf16, #tpu.memory_space<vmem>>, vector<32x576xbf16>
    %c0_2 = arith.constant 0 : index
    %c0_3 = arith.constant 0 : index
    %4 = vector.load %arg2[%c0_2, %c0_3] : memref<576x128xbf16, #tpu.memory_space<vmem>>, vector<576x128xbf16>
    %cst = arith.constant dense<0.000000e+00> : vector<32x128xf32>
    %5 = tpu.matmul %3, %4, %cst {dimension_numbers = #tpu.dot_dimension_numbers<[1], [0], [0], [1], [0, 0, 1, 1], [], []>} : vector<32x576xbf16>, vector<576x128xbf16>, vector<32x128xf32> -> vector<32x128xf32>
    %c0_4 = arith.constant 0 : index
    %c0_5 = arith.constant 0 : index
    %6 = vector.load %arg9[%c0_4, %c0_5] : memref<1x128xf32, #tpu.memory_space<vmem>>, vector<1x128xf32>
    %cst_6 = arith.constant dense<0.000000e+00> : vector<128xf32>
    %7 = vector.multi_reduction <add>, %5, %cst_6 [0] : vector<32x128xf32> to vector<128xf32>
    %8 = vector.shape_cast %7 : vector<128xf32> to vector<1x128xf32>
    %9 = arith.addf %6, %8 : vector<1x128xf32>
    %c0_7 = arith.constant 0 : index
    %c0_8 = arith.constant 0 : index
    %10 = vector.load %arg9[%c0_7, %c0_8] : memref<1x128xf32, #tpu.memory_space<vmem>>, vector<1x128xf32>
    tpu.vector_store %arg9[%c0_7, %c0_8], %9 {strides = array<i32>} : memref<1x128xf32, #tpu.memory_space<vmem>>, vector<1x128xf32>,
    %c0_9 = arith.constant 0 : index
    %c0_10 = arith.constant 0 : index
    %11 = vector.load %arg10[%c0_9, %c0_10] : memref<1x128xf32, #tpu.memory_space<vmem>>, vector<1x128xf32>
    %12 = arith.mulf %5, %5 : vector<32x128xf32>
    %cst_11 = arith.constant dense<0.000000e+00> : vector<128xf32>
    %13 = vector.multi_reduction <add>, %12, %cst_11 [0] : vector<32x128xf32> to vector<128xf32>
    %14 = vector.shape_cast %13 : vector<128xf32> to vector<1x128xf32>
    %15 = arith.addf %11, %14 : vector<1x128xf32>
    %c0_12 = arith.constant 0 : index
    %c0_13 = arith.constant 0 : index
    %16 = vector.load %arg10[%c0_12, %c0_13] : memref<1x128xf32, #tpu.memory_space<vmem>>, vector<1x128xf32>
    tpu.vector_store %arg10[%c0_12, %c0_13], %15 {strides = array<i32>} : memref<1x128xf32, #tpu.memory_space<vmem>>, vector<1x128xf32>,
    %c32_i32 = arith.constant 32 : i32
    %17 = arith.muli %arg0, %c32_i32 : i32
    %18 = tpu.assume_multiple %17, 8 : i32
    %19 = arith.index_cast %18 : i32 to index
    %c0_14 = arith.constant 0 : index
    %20 = vector.load %arg8[%19, %c0_14] : memref<32x128xf32, #tpu.memory_space<vmem>>, vector<32x128xf32>
    tpu.vector_store %arg8[%19, %c0_14], %5 {strides = array<i32>} : memref<32x128xf32, #tpu.memory_space<vmem>>, vector<32x128xf32>,
    %c0_i32_15 = arith.constant 0 : i32
    %21 = arith.cmpi eq, %arg0, %c0_i32_15 : i32
    %22 = arith.extui %21 : i1 to i32
    %c0_i32_16 = arith.constant 0 : i32
    %23 = arith.cmpi ne, %22, %c0_i32_16 : i32
    scf.if %23 {
      %c0_17 = arith.constant 0 : index
      %c0_18 = arith.constant 0 : index
      %24 = vector.load %arg9[%c0_17, %c0_18] : memref<1x128xf32, #tpu.memory_space<vmem>>, vector<1x128xf32>
      %c0_19 = arith.constant 0 : index
      %c0_20 = arith.constant 0 : index
      %25 = vector.load %arg5[%c0_19, %c0_20] : memref<128x8xf32, #tpu.memory_space<vmem>>, vector<128x8xf32>
      %cst_21 = arith.constant dense<0.000000e+00> : vector<1x8xf32>
      %26 = tpu.matmul %24, %25, %cst_21 {dimension_numbers = #tpu.dot_dimension_numbers<[1], [0], [0], [1], [0, 0, 1, 1], [], []>} : vector<1x128xf32>, vector<128x8xf32>, vector<1x8xf32> -> vector<1x8xf32>
      %c0_22 = arith.constant 0 : index
      %c0_23 = arith.constant 0 : index
      %27 = vector.load %arg10[%c0_22, %c0_23] : memref<1x128xf32, #tpu.memory_space<vmem>>, vector<1x128xf32>
      %c0_24 = arith.constant 0 : index
      %c0_25 = arith.constant 0 : index
      %28 = vector.load %arg5[%c0_24, %c0_25] : memref<128x8xf32, #tpu.memory_space<vmem>>, vector<128x8xf32>
      %cst_26 = arith.constant dense<0.000000e+00> : vector<1x8xf32>
      %29 = tpu.matmul %27, %28, %cst_26 {dimension_numbers = #tpu.dot_dimension_numbers<[1], [0], [0], [1], [0, 0, 1, 1], [], []>} : vector<1x128xf32>, vector<128x8xf32>, vector<1x8xf32> -> vector<1x8xf32>
      %cst_27 = arith.constant 0.001953125 : f32
      %30 = vector.broadcast %cst_27 : f32 to vector<1x8xf32>
      %31 = arith.mulf %26, %30 : vector<1x8xf32>
      %cst_28 = arith.constant 0.001953125 : f32
      %32 = vector.broadcast %cst_28 : f32 to vector<1x8xf32>
      %33 = arith.mulf %29, %32 : vector<1x8xf32>
      %34 = arith.mulf %31, %31 : vector<1x8xf32>
      %35 = arith.subf %33, %34 : vector<1x8xf32>
      %cst_29 = arith.constant 9.99999974E-6 : f32
      %36 = vector.broadcast %cst_29 : f32 to vector<1x8xf32>
      %37 = arith.addf %35, %36 : vector<1x8xf32>
      %38 = math.rsqrt %37 : vector<1x8xf32>
      %c0_30 = arith.constant 0 : index
      %c0_31 = arith.constant 0 : index
      %39 = vector.load %arg3[%c0_30, %c0_31] : memref<1x8xf32, #tpu.memory_space<vmem>>, vector<1x8xf32>
      %40 = arith.mulf %39, %38 : vector<1x8xf32>
      %c0_32 = arith.constant 0 : index
      %c0_33 = arith.constant 0 : index
      %41 = vector.load %arg4[%c0_32, %c0_33] : memref<1x8xf32, #tpu.memory_space<vmem>>, vector<1x8xf32>
      %42 = arith.mulf %31, %40 : vector<1x8xf32>
      %43 = arith.subf %41, %42 : vector<1x8xf32>
      %c0_34 = arith.constant 0 : index
      %c0_35 = arith.constant 0 : index
      %44 = vector.load %arg6[%c0_34, %c0_35] : memref<8x128xf32, #tpu.memory_space<vmem>>, vector<8x128xf32>
      %cst_36 = arith.constant dense<0.000000e+00> : vector<1x128xf32>
      %45 = tpu.matmul %40, %44, %cst_36 {dimension_numbers = #tpu.dot_dimension_numbers<[1], [0], [0], [1], [0, 0, 1, 1], [], []>} : vector<1x8xf32>, vector<8x128xf32>, vector<1x128xf32> -> vector<1x128xf32>
      %c0_37 = arith.constant 0 : index
      %c0_38 = arith.constant 0 : index
      %46 = vector.load %arg6[%c0_37, %c0_38] : memref<8x128xf32, #tpu.memory_space<vmem>>, vector<8x128xf32>
      %cst_39 = arith.constant dense<0.000000e+00> : vector<1x128xf32>
      %47 = tpu.matmul %43, %46, %cst_39 {dimension_numbers = #tpu.dot_dimension_numbers<[1], [0], [0], [1], [0, 0, 1, 1], [], []>} : vector<1x8xf32>, vector<8x128xf32>, vector<1x128xf32> -> vector<1x128xf32>
      %c0_40 = arith.constant 0 : index
      %c0_41 = arith.constant 0 : index
      %48 = vector.load %arg8[%c0_40, %c0_41] : memref<32x128xf32, #tpu.memory_space<vmem>>, vector<32x128xf32>
      %49 = vector.broadcast %45 : vector<1x128xf32> to vector<32x128xf32>
      %50 = arith.mulf %48, %49 : vector<32x128xf32>
      %51 = vector.broadcast %47 : vector<1x128xf32> to vector<32x128xf32>
      %52 = arith.addf %50, %51 : vector<32x128xf32>
      %cst_42 = arith.constant 0.000000e+00 : f32
      %53 = vector.broadcast %cst_42 : f32 to vector<32x128xf32>
      %54 = arith.maximumf %52, %53 : vector<32x128xf32>
      %c0_43 = arith.constant 0 : index
      %c0_44 = arith.constant 0 : index
      %55 = vector.load %arg7[%c0_43, %c0_44] : memref<32x128xf32, #tpu.memory_space<vmem>>, vector<32x128xf32>
      tpu.vector_store %arg7[%c0_43, %c0_44], %54 {strides = array<i32>} : memref<32x128xf32, #tpu.memory_space<vmem>>, vector<32x128xf32>,
    } else {
    }
    return
  }
  func.func @transform_0(%arg0: i32) -> (i32, i32) {
    %c0_i32 = arith.constant 0 : i32
    %c0_i32_0 = arith.constant 0 : i32
    return %arg0, %c0_i32 : i32, i32
  }
  func.func @transform_1(%arg0: i32) -> (i32, i32) {
    %c0_i32 = arith.constant 0 : i32
    %c0_i32_0 = arith.constant 0 : i32
    %c0_i32_1 = arith.constant 0 : i32
    return %c0_i32, %c0_i32_0 : i32, i32
  }
  func.func @transform_2(%arg0: i32) -> (i32, i32) {
    %c0_i32 = arith.constant 0 : i32
    %c0_i32_0 = arith.constant 0 : i32
    %c0_i32_1 = arith.constant 0 : i32
    return %c0_i32, %c0_i32_0 : i32, i32
  }
  func.func @transform_3(%arg0: i32) -> (i32, i32) {
    %c0_i32 = arith.constant 0 : i32
    %c0_i32_0 = arith.constant 0 : i32
    %c0_i32_1 = arith.constant 0 : i32
    return %c0_i32, %c0_i32_0 : i32, i32
  }
  func.func @transform_4(%arg0: i32) -> (i32, i32) {
    %c0_i32 = arith.constant 0 : i32
    %c0_i32_0 = arith.constant 0 : i32
    %c0_i32_1 = arith.constant 0 : i32
    return %c0_i32, %c0_i32_0 : i32, i32
  }
  func.func @transform_5(%arg0: i32) -> (i32, i32) {
    %c0_i32 = arith.constant 0 : i32
    %c0_i32_0 = arith.constant 0 : i32
    %c0_i32_1 = arith.constant 0 : i32
    return %c0_i32, %c0_i32_0 : i32, i32
  }
  func.func @transform_6(%arg0: i32) -> (i32, i32) {
    %c0_i32 = arith.constant 0 : i32
    %c0_i32_0 = arith.constant 0 : i32
    %c0_i32_1 = arith.constant 0 : i32
    return %c0_i32, %c0_i32_0 : i32, i32
  }
}

</mosaic_0001>

<bundles_post_ra>
// kernel: tpu_custom_call.1
= control target key start
LH: loop header
LB: loop body
LE: loop exit
PB: predicated region body
PF: predicated region fallthrough
CT: control target
= control target key end

     0   :  { %11 = vsyncpa [#allocation6], 0  ;;  %s1538_s0 = inlined_call_operand.vmem [shape: bf16[32,576], index: 0, kind: input, shape index: {}]   ;;  %s1539_s1 = inlined_call_operand.hbm [shape: bf16[576,128], index: 1, kind: input, shape index: {}]   ;;  %s1540_s2 = inlined_call_operand.vmem [shape: f32[1,8], index: 2, kind: input, shape index: {}]   ;;  %s1541_s3 = inlined_call_operand.vmem [shape: f32[1,8], index: 3, kind: input, shape index: {}]   ;;  %s1542_s4 = inlined_call_operand.vmem [shape: f32[128,8], index: 4, kind: input, shape index: {}]   ;;  %s1543_s5 = inlined_call_operand.vmem [shape: f32[8,128], index: 5, kind: input, shape index: {}]   ;;  %s1544_s6 = inlined_call_operand.hbm [shape: f32[32,128], index: 6, kind: output, shape index: {}]  }
   0x1   :  { %12 = vsyncpa [#allocation7], 0  ;;  %s1347_s21 = smov [#allocation5]   ;;  %s1299_s25 = scalar_lea.hbm %s1539_s1, 4608 }
   0x2   :  { %s20_s22 = sshll.u32 %s1347_s21, 4  ;;  %p1300_p0 = scmp.ne.s32.totalorder %s1539_s1, %s1299_s25  ;;  %s21_s22 = int_to_ptr.vmem [resolvable:$true] %s20_s22 }
   0x3   :  { %p1303_p1 = scmp.lt.u32.totalorder %s1299_s25, %s1539_s1 }
   0x5   :  { %p1305_p2 = pnand %p1303_p1, %p1300_p0 }
   0x7   :  { %1308 = shalt.err (!%p1305_p2)
}
   0x8   :  { %s1309_s30 = scalar_lea.vmem %s21_s22, 4608  ;;  %p1314_p4 = scmp.lt.s32.totalorder %s21_s22, %s21_s22 }
   0x9   :  { %p1310_p3 = scmp.ne.s32.totalorder %s21_s22, %s1309_s30  ;;  %p1315_p5 = scmp.lt.s32.totalorder %s1309_s30, %s1309_s30 }
   0xb   :  { %p1316_p6 = por %p1315_p5, %p1314_p4 }
   0xd   :  { %p1317_p7 = pnand %p1316_p6, %p1310_p3 }
   0xf   :  { %1320 = shalt.err (!%p1317_p7)
}
  0x10   :  { %s1348_s7 = smov 64   ;;  %s1349_s8 = smov 4  }
  0x11   :  { %26 = dma.hbm_to_vmem [thread:$0]  %s1539_s1, 4608, %s21_s22, [#allocation6], %s1348_s7, %s1348_s7, %s1349_s8  }
  0x12   :  { %1343 = dma.done.wait [#allocation6], 4608  }
  0x13   :  { %1344 = vsyncadd [#allocation6], 4294962688  ;;  %v1247_v0 = vld [vmem:[#allocation5 + $0x40] sm:$0xff]   ;;  %v1251_v4 = vld [vmem:[#allocation5 + $0x48] sm:$0xff]   ;;  %vm395_vm0 = vcmask 523264   ;;  %v1350_v49 = vmov 0.0|0.0  }
  0x14   :  { %v1248_v1 = vld [vmem:[#allocation5 + $0xc0] sm:$0xff]   ;;  %998 = vmatprep.subr.bf16.mxu0 %v1247_v0  ;;  %v1252_v5 = vld [vmem:[#allocation5 + $0xc8] sm:$0xff]   ;;  %v1255_v8 = vld [vmem:[#allocation5 + $0x50] sm:$0xff]   ;;  %v1351_v61 = vmov 0.0   ;;  %vm1352_vm1 = vmmov 0   ;;  %vm756_vm2 = vcmask 64512  }
  0x15   :  { %v1249_v2 = vld [vmem:[#allocation5] sm:$0xff]   ;;  %1026 = vmatprep.subr.bf16.mxu1 %v1248_v1  ;;  %v1253_v6 = vld [vmem:[#allocation5 + $0x8] sm:$0xff]   ;;  %v1256_v9 = vld [vmem:[#allocation5 + $0xd0] sm:$0xff]   ;;  %43 = vst [vmem:[#allocation3] sm:$0x1] %v1351_v61 }
  0x16   :  { %v1250_v3 = vld [vmem:[#allocation5 + $0x80] sm:$0xff]   ;;  %999 = vmatpush3.bf16.msra.mxu0 %v1249_v2  ;;  %v1254_v7 = vld [vmem:[#allocation5 + $0x88] sm:$0xff]   ;;  %v1257_v10 = vld [vmem:[#allocation5 + $0x10] sm:$0xff]   ;;  %44 = vst [vmem:[#allocation4] sm:$0x1] %v1351_v61 }
  0x17   :  { %1027 = vmatpush3.bf16.msra.mxu1 %v1250_v3  ;;  %1000 = vmatprep.subr.bf16.mxu0 %v1251_v4  ;;  %v1258_v11 = vld [vmem:[#allocation5 + $0x90] sm:$0xff]   ;;  %v1259_v12 = vld [vmem:[#allocation5 + $0x58] sm:$0xff]   ;;  %v1263_v16 = vld [vmem:[#allocation5 + $0x60] sm:$0xff]  }
  0x18   :  { %1028 = vmatprep.subr.bf16.mxu1 %v1252_v5  ;;  %v1260_v13 = vld [vmem:[#allocation5 + $0xd8] sm:$0xff]   ;;  %v1264_v17 = vld [vmem:[#allocation5 + $0xe0] sm:$0xff]   ;;  %v1267_v20 = vld [vmem:[#allocation5 + $0x68] sm:$0xff]  }
  0x19   :  { %v1261_v14 = vld [vmem:[#allocation5 + $0x18] sm:$0xff]   ;;  %v1265_v18 = vld [vmem:[#allocation5 + $0x20] sm:$0xff]   ;;  %v1268_v21 = vld [vmem:[#allocation5 + $0xe8] sm:$0xff]  }
  0x1a   :  { %1001 = vmatpush3.bf16.msra.mxu0 %v1253_v6  ;;  %v1262_v15 = vld [vmem:[#allocation5 + $0x98] sm:$0xff]   ;;  %v1266_v19 = vld [vmem:[#allocation5 + $0xa0] sm:$0xff]   ;;  %v1269_v22 = vld [vmem:[#allocation5 + $0x28] sm:$0xff]  }
  0x1b   :  { %1029 = vmatpush3.bf16.msra.mxu1 %v1254_v7  ;;  %1002 = vmatprep.subr.bf16.mxu0 %v1255_v8  ;;  %v1270_v23 = vld [vmem:[#allocation5 + $0xa8] sm:$0xff]   ;;  %v1271_v24 = vld [vmem:[#allocation5 + $0x70] sm:$0xff]   ;;  %v1275_v28 = vld [vmem:[#allocation5 + $0x78] sm:$0xff]  }
  0x1c   :  { %1030 = vmatprep.subr.bf16.mxu1 %v1256_v9  ;;  %v1272_v25 = vld [vmem:[#allocation5 + $0xf0] sm:$0xff]   ;;  %v1276_v29 = vld [vmem:[#allocation5 + $0xf8] sm:$0xff]   ;;  %v1285_v36 = vld [vmem:[#allocation5 + $0x100] sm:$0xff]  }
  0x1d   :  { %v1273_v26 = vld [vmem:[#allocation5 + $0x30] sm:$0xff]   ;;  %v1277_v30 = vld [vmem:[#allocation5 + $0x38] sm:$0xff]   ;;  %v1286_v37 = vld [vmem:[#allocation5 + $0x108] sm:$0xff]  }
  0x1e   :  { %1003 = vmatpush3.bf16.msra.mxu0 %v1257_v10  ;;  %v1274_v27 = vld [vmem:[#allocation5 + $0xb0] sm:$0xff]   ;;  %v1278_v31 = vld [vmem:[#allocation5 + $0xb8] sm:$0xff]   ;;  %v588_v47 = vld [vmem:[%s1542_s4 + $0x8] sm:$0xff] }
  0x1f   :  { %1031 = vmatpush3.bf16.msra.mxu1 %v1258_v11  ;;  %1004 = vmatprep.subr.bf16.mxu0 %v1259_v12  ;;  %v1279_v32 = vld [vmem:[%s1538_s0] ss:$20 sps:$4 sm:$0xff]   ;;  %v1281_v33 = vld [vmem:[%s1538_s0 + $0x4] ss:$20 sps:$4 sm:$0xff]   ;;  %v1282_v34 = vld [vmem:[%s1538_s0 + $0x8] ss:$20 sps:$4 sm:$0xff]  }
  0x20   :  { %1032 = vmatprep.subr.bf16.mxu1 %v1260_v13  ;;  %v1284_v35 = vld [vmem:[%s1538_s0 + $0xc] ss:$20 sps:$4 sm:$0xff]   ;;  %434 = vmatprep.mubr.bf16.mxu0 %v1281_v33  ;;  %v1289_v39 = vld [vmem:[%s1538_s0 + $0x34] ss:$20 sps:$4 sm:$0xff]   ;;  %v1292_v42 = vld [vmem:[%s1538_s0 + $0x30] ss:$20 sps:$4 sm:$0xff]  }
  0x21   :  { %483 = vmatprep.mubr.bf16.mxu1 %v1284_v35  ;;  %v1287_v38 = vld [vmem:[%s1538_s0 + $0x2c] ss:$20 sps:$4 sm:$0xff]   ;;  %v1291_v40 = vld [vmem:[%s1538_s0 + $0x28] ss:$20 sps:$4 sm:$0xff]   ;;  %v1293_v41 = vld [vmem:[#allocation5 + $0x110] sm:$0xff]  }
  0x22   :  { %1005 = vmatpush3.bf16.msra.mxu0 %v1261_v14  ;;  %v1295_v43 = vld [vmem:[%s1538_s0 + $0x10] ss:$20 sps:$4 sm:$0xff]   ;;  %v1294_v44 = vld [vmem:[#allocation5 + $0x118] sm:$0xff]   ;;  %v592_v54 = vld [vmem:[%s1542_s4 + $0x28] sm:$0xff] }
  0x23   :  { %1033 = vmatpush3.bf16.msra.mxu1 %v1262_v15  ;;  %1006 = vmatprep.subr.bf16.mxu0 %v1263_v16  ;;  %v1296_v45 = vld [vmem:[%s1538_s0 + $0x38] ss:$20 sps:$4 sm:$0xff]   ;;  %v587_v46 = vld [vmem:[%s1542_s4] sm:$0xff]  ;;  %v589_v50 = vld [vmem:[%s1542_s4 + $0x10] sm:$0xff] }
  0x24   :  { %1034 = vmatprep.subr.bf16.mxu1 %v1264_v17  ;;  %v1191_v48 = vpack.c.bf16 %v588_v47, %v587_v46  ;;  %v590_v51 = vld [vmem:[%s1542_s4 + $0x18] sm:$0xff]  ;;  %v591_v53 = vld [vmem:[%s1542_s4 + $0x20] sm:$0xff]  ;;  %v593_v56 = vld [vmem:[%s1542_s4 + $0x30] sm:$0xff] }
  0x25   :  { %v1194_v52 = vpack.c.bf16 %v590_v51, %v589_v50  ;;  %v1197_v55 = vpack.c.bf16 %v592_v54, %v591_v53  ;;  %v594_v57 = vld [vmem:[%s1542_s4 + $0x38] sm:$0xff]  ;;  %v595_v59 = vld [vmem:[%s1542_s4 + $0x40] sm:$0xff]  ;;  %v596_v60 = vld [vmem:[%s1542_s4 + $0x48] sm:$0xff] }
  0x26   :  { %1007 = vmatpush3.bf16.msra.mxu0 %v1265_v18  ;;  %v1200_v58 = vpack.c.bf16 %v594_v57, %v593_v56  ;;  %v1203_v62 = vpack.c.bf16 %v596_v60, %v595_v59  ;;  %v597_v63 = vld [vmem:[%s1542_s4 + $0x50] sm:$0xff]  ;;  %v598_v0 = vld [vmem:[%s1542_s4 + $0x58] sm:$0xff]  ;;  %v599_v2 = vld [vmem:[%s1542_s4 + $0x60] sm:$0xff] }
  0x27   :  { %1035 = vmatpush3.bf16.msra.mxu1 %v1266_v19  ;;  %1008 = vmatprep.subr.bf16.mxu0 %v1267_v20  ;;  %v1206_v1 = vpack.c.bf16 %v598_v0, %v597_v63  ;;  %v600_v3 = vld [vmem:[%s1542_s4 + $0x68] sm:$0xff]  ;;  %v601_v4 = vld [vmem:[%s1542_s4 + $0x70] sm:$0xff]  ;;  %v602_v6 = vld [vmem:[%s1542_s4 + $0x78] sm:$0xff] }
  0x28   :  { %1036 = vmatprep.subr.bf16.mxu1 %v1268_v21  ;;  %v1209_v5 = vpack.c.bf16 %v600_v3, %v599_v2  ;;  %v1212_v7 = vpack.c.bf16 %v602_v6, %v601_v4  ;;  %v549_v0 = vld [vmem:[#allocation3] sm:$0x1]  ;;  %v561_v3 = vld [vmem:[#allocation4] sm:$0x1] }
  0x2a   :  { %1009 = vmatpush3.bf16.msra.mxu0 %v1269_v22 }
  0x2b   :  { %1037 = vmatpush3.bf16.msra.mxu1 %v1270_v23  ;;  %1010 = vmatprep.subr.bf16.mxu0 %v1271_v24 }
  0x2c   :  { %1038 = vmatprep.subr.bf16.mxu1 %v1272_v25 }
  0x2e   :  { %1011 = vmatpush3.bf16.msra.mxu0 %v1273_v26 }
  0x2f   :  { %1039 = vmatpush3.bf16.msra.mxu1 %v1274_v27  ;;  %1012 = vmatprep.subr.bf16.mxu0 %v1275_v28 }
  0x30   :  { %1040 = vmatprep.subr.bf16.mxu1 %v1276_v29 }
  0x32   :  { %1013 = vmatpush3.bf16.msra.mxu0 %v1277_v30 }
  0x33   :  { %1041 = vmatpush3.bf16.msra.mxu1 %v1278_v31  ;;  %1098 = vmatprep.subr.bf16.mxu0 %v1285_v36 }
  0x34   :  { %1190 = vmatprep.subr.bf16.mxu1 %v1350_v49 }
  0x35   :  { %435 = vmatmul.mubr.bf16.vlgmr.msra.gmra.mrb[0].mxu0 %v1279_v32 }
  0x36   :  { %484 = vmatmul.mubr.bf16.vlgmr.msra.gmra.mrb[0].mxu1 %v1282_v34  ;;  %1099 = vmatpush3.bf16.msra.mxu0 %v1285_v36 }
  0x37   :  { %1100 = vmatprep.subr.bf16.mxu0 %v1286_v37  ;;  %442 = vmatprep.mubr.bf16.mxu0 %v1287_v38 }
  0x38   :  { %491 = vmatprep.mubr.bf16.mxu1 %v1289_v39  ;;  %1192 = vmatpush3.bf16.msra.mxu1 %v1191_v48 }
  0x39   :  { %1193 = vmatprep.subr.bf16.mxu1 %v1350_v49 }
  0x3a   :  { %1101 = vmatpush3.bf16.msra.mxu0 %v1286_v37 }
  0x3b   :  { %1102 = vmatprep.subr.bf16.mxu0 %v1293_v41 }
  0x3c   :  { %1195 = vmatpush3.bf16.msra.mxu1 %v1194_v52 }
  0x3d   :  { %443 = vmatmul.mubr.bf16.gmra.mrb[4].mxu0 %v1291_v40  ;;  %1196 = vmatprep.subr.bf16.mxu1 %v1350_v49 }
  0x3e   :  { %492 = vmatmul.mubr.bf16.gmra.mrb[4].mxu1 %v1292_v42  ;;  %1106 = vmatprep.mubr.msk.bf16.mxu0 %vm395_vm0, %v1295_v43 }
  0x3f   :  { %1103 = vmatpush3.bf16.msra.mxu0 %v1293_v41  ;;  %1142 = vmatprep.mubr.msk.f32.mxu1 %vm1352_vm1, %v1351_v61 }
  0x40   :  { %1104 = vmatprep.subr.bf16.mxu0 %v1294_v44  ;;  %1198 = vmatpush3.bf16.msra.mxu1 %v1197_v55 }
  0x41   :  { %1199 = vmatprep.subr.bf16.mxu1 %v1350_v49 }
  0x43   :  { %1105 = vmatpush3.bf16.msra.mxu0 %v1294_v44 }
  0x44   :  { %1214 = vmatprep.subr.bf16.mxu0 %v1350_v49  ;;  %1201 = vmatpush3.bf16.msra.mxu1 %v1200_v58 }
  0x45   :  { %1202 = vmatprep.subr.bf16.mxu1 %v1350_v49 }
  0x46   :  { %1107 = vmatmul.mubr.msk.bf16.vlgmr.msra.gmra.mrb[8].mxu0 %vm395_vm0, %v1296_v45 }
  0x47   :  { %1216 = vmatpush3.bf16.msra.mxu0 %v1191_v48  ;;  %1177 = vmatprep.mubr.msk.f32.mxu0 %vm1352_vm1, %v1351_v61 }
  0x48   :  { %1217 = vmatprep.subr.bf16.mxu0 %v1350_v49  ;;  %1204 = vmatpush3.bf16.msra.mxu1 %v1203_v62 }
  0x49   :  { %1205 = vmatprep.subr.bf16.mxu1 %v1350_v49 }
  0x4b   :  { %1219 = vmatpush3.bf16.msra.mxu0 %v1194_v52 }
  0x4c   :  { %1220 = vmatprep.subr.bf16.mxu0 %v1350_v49  ;;  %1207 = vmatpush3.bf16.msra.mxu1 %v1206_v1 }
  0x4d   :  { %1208 = vmatprep.subr.bf16.mxu1 %v1350_v49 }
  0x4f   :  { %1222 = vmatpush3.bf16.msra.mxu0 %v1197_v55 }
  0x50   :  { %1223 = vmatprep.subr.bf16.mxu0 %v1350_v49  ;;  %1210 = vmatpush3.bf16.msra.mxu1 %v1209_v5 }
  0x51   :  { %1211 = vmatprep.subr.bf16.mxu1 %v1350_v49 }
  0x53   :  { %1225 = vmatpush3.bf16.msra.mxu0 %v1200_v58 }
  0x54   :  { %1226 = vmatprep.subr.bf16.mxu0 %v1350_v49  ;;  %1213 = vmatpush3.bf16.msra.mxu1 %v1212_v7 }
  0x55   :  { %1180 = vmatprep.subr.mxu1 %v1351_v61 }
  0x57   :  { %1228 = vmatpush3.bf16.msra.mxu0 %v1203_v62 }
  0x58   :  { %1229 = vmatprep.subr.bf16.mxu0 %v1350_v49 }
  0x5b   :  { %1231 = vmatpush3.bf16.msra.mxu0 %v1206_v1 }
  0x5c   :  { %1232 = vmatprep.subr.bf16.mxu0 %v1350_v49 }
  0x5f   :  { %1234 = vmatpush3.bf16.msra.mxu0 %v1209_v5 }
  0x60   :  { %1235 = vmatprep.subr.bf16.mxu0 %v1350_v49 }
  0x63   :  { %1237 = vmatpush3.bf16.msra.mxu0 %v1212_v7 }
 0x108   :  { %v1014_v8 = vpop.f32.mrb[0].mxu0 }
 0x109   :  { %v1042_v9 = vpop.f32.mrb[0].mxu1  ;;  %v1015_v10 = vpop.f32.mrb[1].mxu0 }
 0x10a   :  { %v1016_v11 = vadd.f32 %v1015_v10, %v1014_v8  ;;  %v1043_v12 = vpop.f32.mrb[1].mxu1  ;;  %v1017_v13 = vpop.f32.mrb[2].mxu0 }
 0x10b   :  { %v1044_v14 = vadd.f32 %v1043_v12, %v1042_v9  ;;  %v1045_v15 = vpop.f32.mrb[2].mxu1  ;;  %v1018_v16 = vpop.f32.mrb[3].mxu0  ;;  %v755_v9 = vld [vmem:[%s1543_s5] sm:$0xff] }
 0x10c   :  { %v1019_v17 = vadd.f32 %v1018_v16, %v1017_v13  ;;  %v1046_v18 = vpop.f32.mrb[3].mxu1 }
 0x10d   :  { %v1047_v19 = vadd.f32 %v1046_v18, %v1045_v15  ;;  %v486_v20 = vadd.f32 %v1044_v14, %v1016_v11 }
 0x10f   :  { %v489_v21 = vadd.f32 %v1047_v19, %v1019_v17  ;;  %v750_v19 = vld [vmem:[%s1540_s2] sm:$0x1]  ;;  %s1353_s2 = smov [#allocation8]  }
 0x110   :  { %v1020_v22 = vpop.f32.mrb[4].mxu0 }
 0x111   :  { %v1048_v23 = vpop.f32.mrb[4].mxu1  ;;  %v1021_v24 = vpop.f32.mrb[5].mxu0 }
 0x112   :  { %v1022_v25 = vadd.f32 %v1021_v24, %v1020_v22  ;;  %v1049_v26 = vpop.f32.mrb[5].mxu1  ;;  %v1023_v27 = vpop.f32.mrb[6].mxu0  ;;  %v752_v22 = vld [vmem:[%s1541_s3] sm:$0x1]  ;;  %s936_s3 = sshll.u32 %s1353_s2, 4  ;;  %s937_s3 = int_to_ptr.vmem [resolvable:$true] %s936_s3 }
 0x113   :  { %v1050_v28 = vadd.f32 %v1049_v26, %v1048_v23  ;;  %v1051_v29 = vpop.f32.mrb[6].mxu1  ;;  %v1024_v30 = vpop.f32.mrb[7].mxu0  ;;  %s1321_s14 = scalar_lea.vmem %s937_s3, 512  ;;  %p1326_p9 = scmp.lt.s32.totalorder %s937_s3, %s937_s3 }
 0x114   :  { %v1025_v31 = vadd.f32 %v1024_v30, %v1023_v27  ;;  %v1052_v32 = vpop.f32.mrb[7].mxu1  ;;  %p1322_p8 = scmp.ne.s32.totalorder %s937_s3, %s1321_s14  ;;  %p1327_p10 = scmp.lt.s32.totalorder %s1321_s14, %s1321_s14 }
 0x115   :  { %v1053_v33 = vadd.f32 %v1052_v32, %v1051_v29  ;;  %v494_v34 = vadd.f32 %v1050_v28, %v1022_v25  ;;  %v907_v25 = vlaneseq }
 0x116   :  { %p1328_p11 = por %p1327_p10, %p1326_p9 }
 0x117   :  { %v497_v35 = vadd.f32 %v1053_v33, %v1025_v31  ;;  %v908_v26 = vshrl.u32 %v907_v25, 7 }
 0x118   :  { %p1329_p12 = pnand %p1328_p11, %p1322_p8 }
 0x119   :  { %v1108_v36 = vpop.f32.mrb[8].mxu0  ;;  %v909_v27 = vsub.s32 0, %v908_v26 }
 0x11a   :  { %v1488_v37 = vadd.f32 %v1108_v36, %v494_v34  ;;  %v534_v38 = vpop.f32.mrb[9].mxu0 }
 0x11b   :  { %v1490_v39 = vadd.f32 %v534_v38, %v486_v20  ;;  %v1109_v40 = vpop.f32.mrb[10].mxu0 }
 0x11c   :  { %v1492_v41 = vadd.f32 %v1109_v40, %v497_v35  ;;  %v537_v42 = vpop.f32.mrb[11].mxu0  ;;  %v564_v47 = vmul.f32 %v1488_v37, %v1488_v37 }
 0x11d   :  { %v1494_v43 = vadd.f32 %v537_v42, %v489_v21  ;;  %v562_v44 = vmul.f32 %v1490_v39, %v1490_v39 }
 0x11e   :  { %v565_v50 = vmul.f32 %v1492_v41, %v1492_v41 }
 0x11f   :  { %v550_v45 = vadd.f32 %v1494_v43, %v1490_v39  ;;  %v563_v46 = vmul.f32 %v1494_v43, %v1494_v43 }
 0x121   :  { %v551_v48 = vadd.f32 %v550_v45, %v1488_v37  ;;  %v566_v49 = vadd.f32 %v563_v46, %v562_v44 }
 0x123   :  { %v552_v51 = vadd.f32 %v551_v48, %v1492_v41  ;;  %v567_v52 = vadd.f32 %v566_v49, %v564_v47 }
 0x125   :  { %v553_v53 = vrot.slane %v552_v51, 4  ;;  %v568_v54 = vadd.f32 %v567_v52, %v565_v50 }
 0x127   :  { %v554_v55 = vadd.f32 %v553_v53, %v552_v51  ;;  %v569_v56 = vrot.slane %v568_v54, 4 }
 0x129   :  { %v555_v57 = vrot.slane %v554_v55, 2  ;;  %v570_v58 = vadd.f32 %v569_v56, %v568_v54 }
 0x12b   :  { %v556_v59 = vadd.f32 %v555_v57, %v554_v55  ;;  %v571_v60 = vrot.slane %v570_v58, 2 }
 0x12d   :  { %v557_v62 = vrot.slane %v556_v59, 1  ;;  %v572_v63 = vadd.f32 %v571_v60, %v570_v58 }
 0x12f   :  { %v558_v1 = vadd.f32 %v557_v62, %v556_v59  ;;  %v573_v2 = vrot.slane %v572_v63, 1 }
 0x131   :  { %v574_v4 = vadd.f32 %v573_v2, %v572_v63  ;;  %v559_v5 = vadd.f32 %v558_v1, %v549_v0 }
 0x133   :  { %560 = vst [vmem:[#allocation3] sm:$0x1] %v559_v5  ;;  %v575_v6 = vadd.f32 %v574_v4, %v561_v3 }
 0x135   :  { %576 = vst [vmem:[#allocation4] sm:$0x1] %v575_v6 }
 0x13a   :  { %v586_v7 = vld [vmem:[#allocation3] sm:$0x1] }
 0x13b   :  { %1143 = vmatmul.mubr.f32.vlgmr.msra.gmra.mrb[8].mxu1 %v586_v7 }
 0x13c   :  { %v673_v8 = vld [vmem:[#allocation4] sm:$0x1]  ;;  %1182 = vmatprep.mubr.msk.f32.mxu1 %vm1352_vm1, %v1351_v61  ;;  %1181 = vmatpush3.msra.mxu1 %v755_v9 }
 0x13d   :  { %1178 = vmatmul.mubr.f32.vlgmr.msra.gmra.mrb[12].mxu0 %v673_v8  ;;  %1185 = vmatprep.subr.mxu1 %v1351_v61 }
 0x20e   :  { %v669_v10 = vpop.f32.mrb[8].mxu1 }
 0x20f   :  { %v744_v11 = vmul.f32 0.001953125, %v669_v10  ;;  %v1144_v12 = vpop.f32.mrb[9].mxu1 }
 0x210   :  { %v740_v13 = vpop.f32.mrb[12].mxu0 }
 0x211   :  { %v746_v14 = vmul.f32 %v744_v11, %v744_v11  ;;  %v745_v15 = vmul.f32 0.001953125, %v740_v13  ;;  %v1179_v16 = vpop.f32.mrb[13].mxu0 }
 0x213   :  { %v747_v17 = vsub.f32 %v745_v15, %v746_v14 }
 0x215   :  { %v748_v18 = vadd.f32 1e-05, %v747_v17 }
 0x217   :  { %1297 = vrsqrt.f32 %v748_v18 }
 0x221   :  { %v1298_v20 = vpop.eup %1297 }
 0x222   :  { %v751_v21 = vmul.f32 %v1298_v20, %v750_v19 }
 0x224   :  { %1183 = vmatmul.mubr.msk.f32.vlgmr.msra.gmra.mrb[10].mxu1 %vm756_vm2, %v751_v21  ;;  %v753_v23 = vmul.f32 %v751_v21, %v744_v11 }
 0x225   :  { %1186 = vmatpush3.msra.mxu1 %v755_v9  ;;  %1187 = vmatprep.mubr.msk.f32.mxu1 %vm1352_vm1, %v1351_v61 }
 0x226   :  { %v754_v24 = vsub.f32 %v752_v22, %v753_v23 }
 0x228   :  { %1188 = vmatmul.mubr.msk.f32.vlgmr.msra.gmra.mrb[12].mxu1 %vm756_vm2, %v754_v24 }
 0x2f7   :  { %v826_v28 = vpop.f32.mrb[10].mxu1 }
 0x2f8   :  { %v910_v29 = vrot.slane %v826_v28, %v909_v27  ;;  %v1184_v30 = vpop.f32.mrb[11].mxu1 }
 0x2fa   :  { %v911_v31 = vmul.f32 %v910_v29, %v1490_v39  ;;  %v912_v33 = vmul.f32 %v910_v29, %v1494_v43  ;;  %v913_v34 = vmul.f32 %v910_v29, %v1488_v37  ;;  %v914_v35 = vmul.f32 %v910_v29, %v1492_v41 }
 0x2fb   :  { %v899_v32 = vpop.f32.mrb[12].mxu1 }
 0x2fc   :  { %v918_v36 = vrot.slane %v899_v32, %v909_v27  ;;  %v1189_v38 = vpop.f32.mrb[13].mxu1 }
 0x2fe   :  { %v919_v61 = vadd.f32 %v918_v36, %v911_v31  ;;  %v920_v40 = vadd.f32 %v918_v36, %v912_v33  ;;  %v921_v42 = vadd.f32 %v918_v36, %v913_v34  ;;  %v922_v44 = vadd.f32 %v918_v36, %v914_v35 }
 0x300   :  { %v923_v45 = vmax.f32 %v919_v61, 0.0  ;;  %v924_v46 = vmax.f32 %v920_v40, 0.0  ;;  %v925_v47 = vmax.f32 %v921_v42, 0.0  ;;  %v926_v39 = vmax.f32 %v922_v44, 0.0 }
 0x302   :  { %927 = vst [vmem:[#allocation8] sm:$0xff] %v923_v45  ;;  %928 = vst [vmem:[#allocation8 + $0x8] sm:$0xff] %v924_v46 }
 0x303   :  { %929 = vst [vmem:[#allocation8 + $0x10] sm:$0xff] %v925_v47  ;;  %930 = vst [vmem:[#allocation8 + $0x18] sm:$0xff] %v926_v39 }
 0x304   :  { %1332 = shalt.err (!%p1329_p12)
}
 0x305   :  { %s1333_s17 = scalar_lea.hbm %s1544_s6, 512 }
 0x306   :  { %p1334_p13 = scmp.ne.s32.totalorder %s1544_s6, %s1333_s17  ;;  %p1337_p0 = scmp.lt.u32.totalorder %s1333_s17, %s1544_s6 }
 0x308   :  { %p1339_p1 = pnand %p1337_p0, %p1334_p13 }
 0x30a   :  { %1342 = shalt.err (!%p1339_p1)
}
 0x30b   :  { %s1354_s22 = smov 128   ;;  %s1355_s23 = smov 8  }
 0x30c   :  { %942 = dma.vmem_to_hbm [thread:$0]  %s937_s3, 512, %s1544_s6, [#allocation7], %s1354_s22, %s1354_s22, %s1355_s23  }
 0x30d   :  { %1345 = dma.done.wait [#allocation7], 512  }
 0x30e   :  { %1346 = vsyncadd [#allocation7], 4294966784 }
 0x30f   :  { %946 = vsyncpa [#allocation6], 1 }
 0x310   :  { %947 = vsyncpa [#allocation7], 1 }

</bundles_post_ra>
